<compile_context>
chip_gen: v7x
topology: tpu7x:2x2x1
jax: 0.10.0
libtpu: 0.0.40
codegen_flags: <defaults>
</compile_context>

<pallas_src>
import math

import jax
import jax.numpy as jnp
from jax.experimental import pallas as pl
from jax.experimental.pallas import tpu as pltpu


def _round_up(x, m):
    return -(-x // m) * m


def _pack_slab(blocks):
    """Pack a list of (name, [K, N] f32 array) into one contiguous slab.

    Each block starts at an 8-aligned row offset (zero-padded to a multiple of
    8 rows) and occupies lanes [0:N] of a common lane width W = max(N).
    Returns (slab [R, W], layout {name: (row_offset, K, N)}).
    """
    W = max(int(a.shape[1]) for _, a in blocks)
    rows, layout, off = [], {}, 0
    for name, a in blocks:
        K, N = int(a.shape[0]), int(a.shape[1])
        Kp = _round_up(K, 8)
        padded = jnp.zeros((Kp, W), jnp.float32).at[:K, :N].set(a.astype(jnp.float32))
        rows.append(padded)
        layout[name] = (off, K, N)
        off += Kp
    return jnp.concatenate(rows, axis=0), layout


def init_params(key, input_shape, obs_shape, time_dim, hidden_size):
    """Deterministic synthetic parameters (nn.Linear-style uniform init), packed."""
    half = time_dim // 2
    freqs = jnp.exp(
        jnp.arange(half, dtype=jnp.float32) * -(math.log(10000.0) / (half - 1)))
    # cat(sin(t*f), cos(t*f)) == sin(t*[f|f] + [0|pi/2]); fold the concat away.
    freqs_ext = jnp.concatenate([freqs, freqs]).reshape(1, time_dim)
    phase = jnp.concatenate(
        [jnp.zeros((half,), jnp.float32),
         jnp.full((half,), 0.5 * math.pi, jnp.float32)]).reshape(1, time_dim)

    def lin(k, din, dout):
        kw, kb = jax.random.split(k)
        bound = 1.0 / math.sqrt(din)
        w = jax.random.uniform(kw, (din, dout), jnp.float32, -bound, bound)
        b = jax.random.uniform(kb, (1, dout), jnp.float32, -bound, bound)
        return w, b

    keys = jax.random.split(key, 8)
    input_dim = input_shape + obs_shape + time_dim

    tw1, tb1 = lin(keys[0], time_dim, hidden_size)
    tw2, tb2 = lin(keys[1], hidden_size, time_dim)
    w1, b1 = lin(keys[2], input_dim, hidden_size)
    w2, b2 = lin(keys[3], hidden_size, hidden_size)
    w3, b3 = lin(keys[4], hidden_size, hidden_size)
    w4, b4 = lin(keys[5], hidden_size, hidden_size)
    wmu, bmu = lin(keys[6], hidden_size, obs_shape)
    wstd, bstd = lin(keys[7], hidden_size, obs_shape)
    # TODO(synk): self.fc1 (rnn_hidden_dim) is never used in forward(); omitted.

    # torch.cat([x_n, t, inputs], -1): split w1 rows by source.
    w1_x = w1[:input_shape]
    w1_t = w1[input_shape:input_shape + time_dim]
    w1_o = w1[input_shape + time_dim:]

    # The wrapper packs per-row inputs as [time | x_n | inputs | eps]; build a
    # first-layer weight over that full layout (zero rows for time and eps lanes)
    # so the packed input feeds the MXU with no in-kernel lane slicing.
    fin = 1 + input_shape + 2 * obs_shape
    w_in = jnp.zeros((fin, hidden_size), jnp.float32)
    w_in = w_in.at[1:1 + input_shape].set(w1_x)
    w_in = w_in.at[1 + input_shape:1 + input_shape + obs_shape].set(w1_o)

    # fused mu|std heads
    w_heads = jnp.concatenate([wmu, wstd], axis=1)
    b_heads = jnp.concatenate([bmu, bstd], axis=1)

    blocks = [
        ("freqs", freqs_ext), ("phase", phase),
        ("tw1", tw1), ("tb1", tb1), ("tw2", tw2), ("tb2", tb2),
        ("w_in", w_in), ("w1_t", w1_t), ("b1", b1),
        ("w2", w2), ("b2", b2), ("w3", w3), ("b3", b3), ("w4", w4), ("b4", b4),
        ("w_heads", w_heads), ("b_heads", b_heads),
    ]
    slab, layout = _pack_slab(blocks)
    return {
        "slab": slab,
        "layout": layout,
        "dims": dict(input_shape=input_shape, obs_shape=obs_shape,
                     time_dim=time_dim, hidden_size=hidden_size),
    }


def _make_kernel(layout, input_shape, obs_shape):
    log_2pi = math.log(2.0 * math.pi)
    eps_off = 1 + input_shape + obs_shape

    def kernel(in_ref, slab_ref, out_ref):
        f32 = jnp.float32

        def blk(name):
            r, k, n = layout[name]
            return slab_ref[r:r + k, 0:n]      # static, 8-row-aligned slice

        xin = in_ref[...]                       # [TB, 1 + in + obs + obs]
        t = xin[:, 0:1]                         # diffusion timestep column
        eps = xin[:, eps_off:eps_off + obs_shape]

        # ---- SinusoidalPosEmb: cat(sin(t*f), cos(t*f)) == sin(t*f_ext + phase)
        emb = jnp.sin(t * blk("freqs") + blk("phase"))                 # [TB, time_dim]

        # ---- time_mlp: Linear -> ReLU -> Linear
        h_t = jnp.maximum(
            jnp.dot(emb, blk("tw1"), preferred_element_type=f32) + blk("tb1"), 0.0)
        t_emb = jnp.dot(h_t, blk("tw2"), preferred_element_type=f32) + blk("tb2")

        # ---- trunk: Linear(cat([x_n, t, inputs])) -> ReLU, then 3x (Linear -> ReLU)
        h = (jnp.dot(xin, blk("w_in"), preferred_element_type=f32)
             + jnp.dot(t_emb, blk("w1_t"), preferred_element_type=f32)
             + blk("b1"))
        h = jnp.maximum(h, 0.0)
        h = jnp.maximum(jnp.dot(h, blk("w2"), preferred_element_type=f32) + blk("b2"), 0.0)
        h = jnp.maximum(jnp.dot(h, blk("w3"), preferred_element_type=f32) + blk("b3"), 0.0)
        h = jnp.maximum(jnp.dot(h, blk("w4"), preferred_element_type=f32) + blk("b4"), 0.0)

        # ---- fused mu|std heads: one matmul, lane-sliced
        hz = jnp.dot(h, blk("w_heads"), preferred_element_type=f32) + blk("b_heads")
        mu = hz[:, :obs_shape]
        pre_std = hz[:, obs_shape:]
        # softplus, numerically stable
        std = jnp.maximum(pre_std, 0.0) + jnp.log1p(jnp.exp(-jnp.abs(pre_std)))

        # ---- Normal(mu, std).rsample() with externally supplied eps.
        # (z - mu)/std == eps exactly, so use eps directly in log_prob.
        z = mu + std * eps
        log_prob = -0.5 * (eps * eps) - jnp.log(std) - 0.5 * log_2pi
        actions = jnp.tanh(z)
        # NOTE: reproduces the PyTorch reference exactly (tanh applied twice here).
        log_prob = log_prob - jnp.log(1.0 - jnp.square(jnp.tanh(actions)) + 1e-07)

        out_ref[...] = jnp.concatenate([actions, log_prob], axis=-1)

    return kernel


def model_mlp_forward(params, x_n, time, inputs, eps):
    dims = params["dims"]
    obs = dims["obs_shape"]
    in_shape = dims["input_shape"]
    slab = params["slab"]

    B = x_n.shape[0]
    # Single lane-contiguous per-row input: [time | x_n | inputs | eps]
    packed = jnp.concatenate(
        [time.reshape(B, 1).astype(jnp.float32),
         x_n.astype(jnp.float32),
         inputs.astype(jnp.float32),
         eps.astype(jnp.float32)], axis=-1)
    fin = packed.shape[-1]

    # Batch tiling: one grid step handles TB rows; weight slab stays VMEM-resident.
    TB = min(512, _round_up(B, 8))
    B_pad = _round_up(B, TB)
    if B_pad != B:
        packed = jnp.concatenate(
            [packed, jnp.zeros((B_pad - B, fin), jnp.float32)], axis=0)

    grid_spec = pltpu.PrefetchScalarGridSpec(
        num_scalar_prefetch=0,
        grid=(B_pad // TB,),
        in_specs=[
            pl.BlockSpec((TB, fin), lambda i: (i, 0)),       # packed per-row inputs
            pl.BlockSpec(slab.shape, lambda i: (0, 0)),      # resident packed weights
        ],
        out_specs=pl.BlockSpec((TB, 2 * obs), lambda i: (i, 0)),
    )

    out = pl.pallas_call(
        _make_kernel(params["layout"], in_shape, obs),
        out_shape=jax.ShapeDtypeStruct((B_pad, 2 * obs), jnp.float32),
        grid_spec=grid_spec,
        compiler_params=pltpu.CompilerParams(dimension_semantics=("parallel",)),
    )(packed, slab)

    actions = out[:B, :obs]
    log_prob = out[:B, obs:]
    return {"actions": actions, "hidden_state": None, "log_prob": log_prob}


if __name__ == "__main__":
    # Small shapes implied by the module
    B = 8            # batch
    INPUT_SHAPE = 6  # x_n feature dim
    OBS_SHAPE = 4    # args.obs_shape (also output dim of fc_mu / fc_std)
    TIME_DIM = 16    # args.time_dim
    HIDDEN = 32      # args.hidden_size

    root = jax.random.PRNGKey(0)
    k_param, k_x, k_t, k_obs, k_eps = jax.random.split(root, 5)

    params = init_params(k_param, INPUT_SHAPE, OBS_SHAPE, TIME_DIM, HIDDEN)

    x_n = jax.random.normal(k_x, (B, INPUT_SHAPE), jnp.float32)
    time = jax.random.uniform(k_t, (B,), jnp.float32, 0.0, 10.0)   # diffusion timestep per sample
    inputs = jax.random.normal(k_obs, (B, OBS_SHAPE), jnp.float32)
    eps = jax.random.normal(k_eps, (B, OBS_SHAPE), jnp.float32)    # rsample() noise

    out = model_mlp_forward(params, x_n, time, inputs, eps)
    jax.block_until_ready(out["actions"])
    jax.block_until_ready(out["log_prob"])

    assert out["actions"].shape == (B, OBS_SHAPE)
    assert out["log_prob"].shape == (B, OBS_SHAPE)
    assert out["hidden_state"] is None
    print("KERNEL_OK")
</pallas_src>

<mosaic_0001>
module attributes {stable_mosaic.version = 11 : i64} {
  func.func @kernel(%arg0: i32, %arg1: memref<8x15xf32, #tpu.memory_space<vmem>>, %arg2: memref<280x32xf32, #tpu.memory_space<vmem>>, %arg3: memref<8x8xf32, #tpu.memory_space<vmem>>) attributes {dimension_semantics = [#tpu.dimension_semantics<parallel>], iteration_bounds = array<i64: 1>, scalar_prefetch = 0 : i64, scratch_operands = 0 : i64, tpu.core_type = #tpu.core_type<tc>, window_params = [{transform_indices = @transform_0, window_bounds = array<i64: 8, 15>}, {pipeline_mode = #tpu.pipeline_mode<synchronous>, transform_indices = @transform_1, window_bounds = array<i64: 280, 32>}, {transform_indices = @transform_2, window_bounds = array<i64: 8, 8>}]} {
    %c0 = arith.constant 0 : index
    %c0_0 = arith.constant 0 : index
    %0 = vector.load %arg1[%c0, %c0_0] : memref<8x15xf32, #tpu.memory_space<vmem>>, vector<8x15xf32>
    %1 = vector.extract_strided_slice %0 {offsets = [0, 0], sizes = [8, 1], strides = [1, 1]} : vector<8x15xf32> to vector<8x1xf32>
    %2 = vector.extract_strided_slice %0 {offsets = [0, 11], sizes = [8, 4], strides = [1, 1]} : vector<8x15xf32> to vector<8x4xf32>
    %c0_1 = arith.constant 0 : index
    %c0_2 = arith.constant 0 : index
    %3 = vector.load %arg2[%c0_1, %c0_2] : memref<280x32xf32, #tpu.memory_space<vmem>>, vector<1x16xf32>
    %4 = vector.broadcast %1 : vector<8x1xf32> to vector<8x16xf32>
    %5 = vector.broadcast %3 : vector<1x16xf32> to vector<8x16xf32>
    %6 = arith.mulf %4, %5 : vector<8x16xf32>
    %c8 = arith.constant 8 : index
    %c0_3 = arith.constant 0 : index
    %7 = vector.load %arg2[%c8, %c0_3] : memref<280x32xf32, #tpu.memory_space<vmem>>, vector<1x16xf32>
    %8 = vector.broadcast %7 : vector<1x16xf32> to vector<8x16xf32>
    %9 = arith.addf %6, %8 : vector<8x16xf32>
    %10 = math.sin %9 : vector<8x16xf32>
    %c16 = arith.constant 16 : index
    %c0_4 = arith.constant 0 : index
    %11 = vector.load %arg2[%c16, %c0_4] : memref<280x32xf32, #tpu.memory_space<vmem>>, vector<16x32xf32>
    %cst = arith.constant dense<0.000000e+00> : vector<8x32xf32>
    %12 = tpu.matmul %10, %11, %cst {dimension_numbers = #tpu.dot_dimension_numbers<[1], [0], [0], [1], [0, 0, 1, 1], [], []>} : vector<8x16xf32>, vector<16x32xf32>, vector<8x32xf32> -> vector<8x32xf32>
    %c32 = arith.constant 32 : index
    %c0_5 = arith.constant 0 : index
    %13 = vector.load %arg2[%c32, %c0_5] : memref<280x32xf32, #tpu.memory_space<vmem>>, vector<1x32xf32>
    %14 = vector.broadcast %13 : vector<1x32xf32> to vector<8x32xf32>
    %15 = arith.addf %12, %14 : vector<8x32xf32>
    %cst_6 = arith.constant 0.000000e+00 : f32
    %16 = vector.broadcast %cst_6 : f32 to vector<8x32xf32>
    %17 = arith.maximumf %15, %16 : vector<8x32xf32>
    %c40 = arith.constant 40 : index
    %c0_7 = arith.constant 0 : index
    %18 = vector.load %arg2[%c40, %c0_7] : memref<280x32xf32, #tpu.memory_space<vmem>>, vector<32x16xf32>
    %cst_8 = arith.constant dense<0.000000e+00> : vector<8x16xf32>
    %19 = tpu.matmul %17, %18, %cst_8 {dimension_numbers = #tpu.dot_dimension_numbers<[1], [0], [0], [1], [0, 0, 1, 1], [], []>} : vector<8x32xf32>, vector<32x16xf32>, vector<8x16xf32> -> vector<8x16xf32>
    %c72 = arith.constant 72 : index
    %c0_9 = arith.constant 0 : index
    %20 = vector.load %arg2[%c72, %c0_9] : memref<280x32xf32, #tpu.memory_space<vmem>>, vector<1x16xf32>
    %21 = vector.broadcast %20 : vector<1x16xf32> to vector<8x16xf32>
    %22 = arith.addf %19, %21 : vector<8x16xf32>
    %c80 = arith.constant 80 : index
    %c0_10 = arith.constant 0 : index
    %23 = vector.load %arg2[%c80, %c0_10] : memref<280x32xf32, #tpu.memory_space<vmem>>, vector<15x32xf32>
    %cst_11 = arith.constant dense<0.000000e+00> : vector<8x32xf32>
    %24 = tpu.matmul %0, %23, %cst_11 {dimension_numbers = #tpu.dot_dimension_numbers<[1], [0], [0], [1], [0, 0, 1, 1], [], []>} : vector<8x15xf32>, vector<15x32xf32>, vector<8x32xf32> -> vector<8x32xf32>
    %c96 = arith.constant 96 : index
    %c0_12 = arith.constant 0 : index
    %25 = vector.load %arg2[%c96, %c0_12] : memref<280x32xf32, #tpu.memory_space<vmem>>, vector<16x32xf32>
    %cst_13 = arith.constant dense<0.000000e+00> : vector<8x32xf32>
    %26 = tpu.matmul %22, %25, %cst_13 {dimension_numbers = #tpu.dot_dimension_numbers<[1], [0], [0], [1], [0, 0, 1, 1], [], []>} : vector<8x16xf32>, vector<16x32xf32>, vector<8x32xf32> -> vector<8x32xf32>
    %27 = arith.addf %24, %26 : vector<8x32xf32>
    %c112 = arith.constant 112 : index
    %c0_14 = arith.constant 0 : index
    %28 = vector.load %arg2[%c112, %c0_14] : memref<280x32xf32, #tpu.memory_space<vmem>>, vector<1x32xf32>
    %29 = vector.broadcast %28 : vector<1x32xf32> to vector<8x32xf32>
    %30 = arith.addf %27, %29 : vector<8x32xf32>
    %cst_15 = arith.constant 0.000000e+00 : f32
    %31 = vector.broadcast %cst_15 : f32 to vector<8x32xf32>
    %32 = arith.maximumf %30, %31 : vector<8x32xf32>
    %c120 = arith.constant 120 : index
    %c0_16 = arith.constant 0 : index
    %33 = vector.load %arg2[%c120, %c0_16] : memref<280x32xf32, #tpu.memory_space<vmem>>, vector<32x32xf32>
    %cst_17 = arith.constant dense<0.000000e+00> : vector<8x32xf32>
    %34 = tpu.matmul %32, %33, %cst_17 {dimension_numbers = #tpu.dot_dimension_numbers<[1], [0], [0], [1], [0, 0, 1, 1], [], []>} : vector<8x32xf32>, vector<32x32xf32>, vector<8x32xf32> -> vector<8x32xf32>
    %c152 = arith.constant 152 : index
    %c0_18 = arith.constant 0 : index
    %35 = vector.load %arg2[%c152, %c0_18] : memref<280x32xf32, #tpu.memory_space<vmem>>, vector<1x32xf32>
    %36 = vector.broadcast %35 : vector<1x32xf32> to vector<8x32xf32>
    %37 = arith.addf %34, %36 : vector<8x32xf32>
    %cst_19 = arith.constant 0.000000e+00 : f32
    %38 = vector.broadcast %cst_19 : f32 to vector<8x32xf32>
    %39 = arith.maximumf %37, %38 : vector<8x32xf32>
    %c160 = arith.constant 160 : index
    %c0_20 = arith.constant 0 : index
    %40 = vector.load %arg2[%c160, %c0_20] : memref<280x32xf32, #tpu.memory_space<vmem>>, vector<32x32xf32>
    %cst_21 = arith.constant dense<0.000000e+00> : vector<8x32xf32>
    %41 = tpu.matmul %39, %40, %cst_21 {dimension_numbers = #tpu.dot_dimension_numbers<[1], [0], [0], [1], [0, 0, 1, 1], [], []>} : vector<8x32xf32>, vector<32x32xf32>, vector<8x32xf32> -> vector<8x32xf32>
    %c192 = arith.constant 192 : index
    %c0_22 = arith.constant 0 : index
    %42 = vector.load %arg2[%c192, %c0_22] : memref<280x32xf32, #tpu.memory_space<vmem>>, vector<1x32xf32>
    %43 = vector.broadcast %42 : vector<1x32xf32> to vector<8x32xf32>
    %44 = arith.addf %41, %43 : vector<8x32xf32>
    %cst_23 = arith.constant 0.000000e+00 : f32
    %45 = vector.broadcast %cst_23 : f32 to vector<8x32xf32>
    %46 = arith.maximumf %44, %45 : vector<8x32xf32>
    %c200 = arith.constant 200 : index
    %c0_24 = arith.constant 0 : index
    %47 = vector.load %arg2[%c200, %c0_24] : memref<280x32xf32, #tpu.memory_space<vmem>>, vector<32x32xf32>
    %cst_25 = arith.constant dense<0.000000e+00> : vector<8x32xf32>
    %48 = tpu.matmul %46, %47, %cst_25 {dimension_numbers = #tpu.dot_dimension_numbers<[1], [0], [0], [1], [0, 0, 1, 1], [], []>} : vector<8x32xf32>, vector<32x32xf32>, vector<8x32xf32> -> vector<8x32xf32>
    %c232 = arith.constant 232 : index
    %c0_26 = arith.constant 0 : index
    %49 = vector.load %arg2[%c232, %c0_26] : memref<280x32xf32, #tpu.memory_space<vmem>>, vector<1x32xf32>
    %50 = vector.broadcast %49 : vector<1x32xf32> to vector<8x32xf32>
    %51 = arith.addf %48, %50 : vector<8x32xf32>
    %cst_27 = arith.constant 0.000000e+00 : f32
    %52 = vector.broadcast %cst_27 : f32 to vector<8x32xf32>
    %53 = arith.maximumf %51, %52 : vector<8x32xf32>
    %c240 = arith.constant 240 : index
    %c0_28 = arith.constant 0 : index
    %54 = vector.load %arg2[%c240, %c0_28] : memref<280x32xf32, #tpu.memory_space<vmem>>, vector<32x8xf32>
    %cst_29 = arith.constant dense<0.000000e+00> : vector<8x8xf32>
    %55 = tpu.matmul %53, %54, %cst_29 {dimension_numbers = #tpu.dot_dimension_numbers<[1], [0], [0], [1], [0, 0, 1, 1], [], []>} : vector<8x32xf32>, vector<32x8xf32>, vector<8x8xf32> -> vector<8x8xf32>
    %c272 = arith.constant 272 : index
    %c0_30 = arith.constant 0 : index
    %56 = vector.load %arg2[%c272, %c0_30] : memref<280x32xf32, #tpu.memory_space<vmem>>, vector<1x8xf32>
    %57 = vector.broadcast %56 : vector<1x8xf32> to vector<8x8xf32>
    %58 = arith.addf %55, %57 : vector<8x8xf32>
    %59 = vector.extract_strided_slice %58 {offsets = [0, 0], sizes = [8, 4], strides = [1, 1]} : vector<8x8xf32> to vector<8x4xf32>
    %60 = vector.extract_strided_slice %58 {offsets = [0, 4], sizes = [8, 4], strides = [1, 1]} : vector<8x8xf32> to vector<8x4xf32>
    %cst_31 = arith.constant 0.000000e+00 : f32
    %61 = vector.broadcast %cst_31 : f32 to vector<8x4xf32>
    %62 = arith.maximumf %60, %61 : vector<8x4xf32>
    %63 = math.absf %60 : vector<8x4xf32>
    %cst_32 = arith.constant 0.000000e+00 : f32
    %64 = vector.broadcast %cst_32 : f32 to vector<8x4xf32>
    %65 = arith.subf %64, %63 : vector<8x4xf32>
    %66 = math.exp %65 : vector<8x4xf32>
    %67 = math.log1p %66 : vector<8x4xf32>
    %68 = arith.addf %62, %67 : vector<8x4xf32>
    %69 = arith.mulf %68, %2 : vector<8x4xf32>
    %70 = arith.addf %59, %69 : vector<8x4xf32>
    %71 = arith.mulf %2, %2 : vector<8x4xf32>
    %cst_33 = arith.constant -5.000000e-01 : f32
    %72 = vector.broadcast %cst_33 : f32 to vector<8x4xf32>
    %73 = arith.mulf %72, %71 : vector<8x4xf32>
    %74 = math.log %68 : vector<8x4xf32>
    %75 = arith.subf %73, %74 : vector<8x4xf32>
    %cst_34 = arith.constant 0.918938517 : f32
    %76 = vector.broadcast %cst_34 : f32 to vector<8x4xf32>
    %77 = arith.subf %75, %76 : vector<8x4xf32>
    %78 = math.tanh %70 : vector<8x4xf32>
    %79 = math.tanh %78 : vector<8x4xf32>
    %80 = arith.mulf %79, %79 : vector<8x4xf32>
    %cst_35 = arith.constant 1.000000e+00 : f32
    %81 = vector.broadcast %cst_35 : f32 to vector<8x4xf32>
    %82 = arith.subf %81, %80 : vector<8x4xf32>
    %cst_36 = arith.constant 1.000000e-07 : f32
    %83 = vector.broadcast %cst_36 : f32 to vector<8x4xf32>
    %84 = arith.addf %82, %83 : vector<8x4xf32>
    %85 = math.log %84 : vector<8x4xf32>
    %86 = arith.subf %77, %85 : vector<8x4xf32>
    %87 = tpu.concatenate %78, %86 in 1 : vector<8x4xf32>, vector<8x4xf32> -> vector<8x8xf32>
    %c0_37 = arith.constant 0 : index
    %c0_38 = arith.constant 0 : index
    %88 = vector.load %arg3[%c0_37, %c0_38] : memref<8x8xf32, #tpu.memory_space<vmem>>, vector<8x8xf32>
    tpu.vector_store %arg3[%c0_37, %c0_38], %87 {strides = array<i32>} : memref<8x8xf32, #tpu.memory_space<vmem>>, vector<8x8xf32>,
    return
  }
  func.func @transform_0(%arg0: i32) -> (i32, i32) {
    %c0_i32 = arith.constant 0 : i32
    %c0_i32_0 = arith.constant 0 : i32
    return %arg0, %c0_i32 : i32, i32
  }
  func.func @transform_1(%arg0: i32) -> (i32, i32) {
    %c0_i32 = arith.constant 0 : i32
    %c0_i32_0 = arith.constant 0 : i32
    %c0_i32_1 = arith.constant 0 : i32
    return %c0_i32, %c0_i32_0 : i32, i32
  }
  func.func @transform_2(%arg0: i32) -> (i32, i32) {
    %c0_i32 = arith.constant 0 : i32
    %c0_i32_0 = arith.constant 0 : i32
    return %arg0, %c0_i32 : i32, i32
  }
}

</mosaic_0001>

<bundles_post_ra>
// kernel: tpu_custom_call.1
= control target key start
LH: loop header
LB: loop body
LE: loop exit
PB: predicated region body
PF: predicated region fallthrough
CT: control target
= control target key end

     0   :  { %v1093_v1 = vmov 0   ;;  %s1310_s0 = inlined_call_operand.vmem [shape: f32[8,15], index: 0, kind: input, shape index: {}]   ;;  %s1311_s1 = inlined_call_operand.vmem [shape: f32[280,32], index: 1, kind: input, shape index: {}]   ;;  %s1312_s2 = inlined_call_operand.hbm [shape: f32[8,8], index: 2, kind: output, shape index: {}]  }
   0x1   :  { %v1127_v0 = vld [vmem:[%s1310_s0] sm:$0xff]  ;;  %1052 = vset.pattern.permute.xlu0 %v1093_v1 }
   0x2   :  { %16 = vperm.xlu0 %1052, %v1127_v0  }
   0x3   :  { %7 = vsyncpa [#allocation3], 0  ;;  %v134_v2 = vld [vmem:[%s1311_s1 + $0x10] sm:$0xff]  ;;  %v135_v3 = vld [vmem:[%s1311_s1 + $0x18] sm:$0xff]  ;;  %v1094_v4 = vmov 0.0|0.0   ;;  %vm1095_vm0 = vmmov 0  }
   0x4   :  { %992 = vmatprep.subr.bf16.mxu0 %v1094_v4  ;;  %v993_v5 = vpack.c.bf16 %v135_v3, %v134_v2  ;;  %v1096_v6 = vmov 0.0   ;;  %995 = vmatprep.subr.bf16.mxu1 %v1094_v4  ;;  %v216_v7 = vld [vmem:[%s1311_s1 + $0x28] sm:$0xff]  ;;  %v217_v8 = vld [vmem:[%s1311_s1 + $0x30] sm:$0xff]  ;;  %v859_v10 = vld [vmem:[%s1311_s1] ss:$0 sm:$0xff]  ;;  %vm141_vm13 = vcmask 130048  }
   0x5   :  { %920 = vmatprep.mubr.msk.f32.mxu0 %vm1095_vm0, %v1096_v6  ;;  %931 = vmatprep.mubr.msk.f32.mxu1 %vm1095_vm0, %v1096_v6  ;;  %v996_v9 = vpack.c.bf16 %v217_v8, %v216_v7  ;;  %v860_v11 = vld [vmem:[%s1311_s1 + $0x8] ss:$0 sm:$0xff]  ;;  %v1097_v26 = vmov 2102212464   ;;  %v1098_v28 = vmov 920167782  }
   0x6   :  { %994 = vmatpush3.bf16.msra.mxu0 %v993_v5  ;;  %v1099_v32 = vmov 1326507024   ;;  %v1100_v34 = vmov 683565275   ;;  %v1101_v36 = vmov 2475754826  }
   0x7   :  { %1001 = vmatprep.subr.bf16.mxu0 %v1094_v4  ;;  %997 = vmatpush3.bf16.msra.mxu1 %v996_v9  ;;  %v1102_v39 = vmov 2131351028   ;;  %vm225_vm15 = vcmask 261120   ;;  %s1104_s18 = smov 121   ;;  %s1106_s23 = smov 7  }
   0x8   :  { %998 = vmatprep.subr.bf16.mxu1 %v1094_v4  ;;  %806 = vrot.lane.b32.xlu0 %v1127_v0, %s1104_s18  ;;  %s1107_s24 = smov 11   ;;  %s1108_s25 = smov [#allocation2]  }
   0x9   :  { %s851_s26 = sshll.u32 %s1108_s25, 4  ;;  %s852_s26 = int_to_ptr.vmem [resolvable:$true] %s851_s26 }
   0xa   :  { %s1069_s27 = scalar_lea.vmem %s852_s26, 128  ;;  %p1074_p1 = scmp.lt.s32.totalorder %s852_s26, %s852_s26 }
   0xb   :  { %p1070_p0 = scmp.ne.s32.totalorder %s852_s26, %s1069_s27  ;;  %p1075_p2 = scmp.lt.s32.totalorder %s1069_s27, %s1069_s27 }
   0xd   :  { %p1076_p3 = por %p1075_p2, %p1074_p1 }
   0xf   :  { %p1077_p4 = pnand %p1076_p3, %p1070_p0 }
  0x81   :  { %v17_v12 = vpop.permute.xlu0 %16 }
  0x82   :  { %v23_v13 = vmul.f32 %v859_v10, %v17_v12 }
  0x84   :  { %v1156_v14 = vadd.f32 %v860_v11, %v23_v13 }
  0x86   :  { %v33_v15 = vand.u32 2139095040, %v1156_v14  ;;  %v30_v16 = vand.u32 2147483647, %v1156_v14  ;;  %vm32_vm8 = vcmp.lt.s32.totalorder %v1156_v14, 0  ;;  %vm122_vm14 = vweird.f32 %v1156_v14 }
  0x88   :  { %v34_v17 = vshrl.u32 %v33_v15, 23  ;;  %v37_v19 = vand.u32 8388607, %v30_v16  ;;  %vm31_vm9 = vcmp.le.f32.partialorder %v30_v16, 0.7853982 }
  0x8a   :  { %v861_v18 = vadd.s32 4294967169, %v34_v17  ;;  %v38_v22 = vor.u32 8388608, %v37_v19 }
  0x8c   :  { %v40_v20 = vadd.s32 1, %v861_v18  ;;  %v78_v30 = vshll.u32 %v38_v22, 8 }
  0x8e   :  { %vm41_vm1 = vcmp.gt.s32.totalorder %v40_v20, 0 }
  0x8f   :  { %v42_v21 = vsel %vm41_vm1, %v40_v20, 0  ;;  %vm379_vm1 = vcmask 1046528  }
  0x90   :  { %v44_v23 = vand.u32 31, %v42_v21  ;;  %v43_v24 = vshrl.u32 %v42_v21, 5 }
  0x92   :  { %v45_v25 = vsub.s32 32, %v44_v23  ;;  %v56_v27 = vshll.u32 %v1097_v26, %v44_v23  ;;  %v59_v29 = vshll.u32 %v1098_v28, %v44_v23  ;;  %v47_v35 = vshll.u32 %v1100_v34, %v44_v23 }
  0x93   :  { %v50_v38 = vshll.u32 %v1101_v36, %v44_v23  ;;  %v53_v41 = vshll.u32 %v1102_v39, %v44_v23  ;;  %vm65_vm2 = vcmp.lt.s32.totalorder %v43_v24, 4  ;;  %vm62_vm3 = vcmp.lt.s32.totalorder %v43_v24, 1 }
  0x94   :  { %v57_v31 = vshrl.u32 %v1098_v28, %v45_v25  ;;  %v60_v33 = vshrl.u32 %v1099_v32, %v45_v25  ;;  %v48_v37 = vshrl.u32 %v1101_v36, %v45_v25  ;;  %v51_v40 = vshrl.u32 %v1102_v39, %v45_v25 }
  0x95   :  { %v54_v42 = vshrl.u32 %v1097_v26, %v45_v25  ;;  %v46_v46 = vshrl.u32 %v1100_v34, %v45_v25  ;;  %vm63_vm4 = vcmp.lt.s32.totalorder %v43_v24, 2  ;;  %vm64_vm5 = vcmp.lt.s32.totalorder %v43_v24, 3 }
  0x96   :  { %v58_v43 = vor.u32 %v57_v31, %v56_v27  ;;  %v61_v44 = vor.u32 %v60_v33, %v59_v29  ;;  %v49_v45 = vor.u32 %v48_v37, %v47_v35  ;;  %v52_v47 = vor.u32 %v51_v40, %v50_v38 }
  0x97   :  { %v55_v48 = vor.u32 %v54_v42, %v53_v41 }
  0x98   :  { %v71_v49 = vsel %vm65_vm2, %v58_v43, 920167782  ;;  %v75_v50 = vsel %vm65_vm2, %v61_v44, 1326507024  ;;  %v70_v52 = vsel %vm62_vm3, %v49_v45, %v52_v47  ;;  %v66_v55 = vsel %vm62_vm3, %v46_v46, %v49_v45  ;;  %v218_v46 = vld [vmem:[%s1311_s1 + $0x38] sm:$0xff] }
  0x99   :  { %v67_v51 = vsel %vm65_vm2, %v55_v48, 2102212464  ;;  %v72_v53 = vsel %vm64_vm5, %v55_v48, %v71_v49  ;;  %v74_v54 = vsel %vm62_vm3, %v52_v47, %v55_v48  ;;  %v76_v58 = vsel %vm64_vm5, %v58_v43, %v75_v50  ;;  %v302_v49 = vld [vmem:[%s1311_s1 + $0x68] sm:$0xff] }
  0x9a   :  { %v68_v56 = vsel %vm64_vm5, %v52_v47, %v67_v51  ;;  %v73_v57 = vsel %vm63_vm4, %v70_v52, %v72_v53  ;;  %v77_v59 = vsel %vm63_vm4, %v74_v54, %v76_v58  ;;  %v219_v47 = vld [vmem:[%s1311_s1 + $0x40] sm:$0xff]  ;;  %v867_v58 = vld [vmem:[%s1311_s1 + $0x48] ss:$0 sm:$0xff]  ;;  %vm1103_vm2 = vmmov 1  }
  0x9b   :  { %v1162_v60 = vmul.u32.u64.low %v78_v30, %v73_v57  ;;  %v1163_v61 = vmul.u32.u64.high %v78_v30, %v73_v57, %v1162_v60  ;;  %v1165_v62 = vmul.u32.u64.low %v78_v30, %v77_v59  ;;  %v1166_v63 = vmul.u32.u64.high %v78_v30, %v77_v59, %v1165_v62  ;;  %v865_v51 = vld [vmem:[%s1311_s1 + $0x20] ss:$0 sm:$0xff]  ;;  %v300_v57 = vld [vmem:[%s1311_s1 + $0x58] sm:$0x7f]  ;;  %vm1006_vm3 = vmpackc.low %vm379_vm1, %vm1103_vm2 }
  0x9c   :  { %v69_v1 = vsel %vm63_vm4, %v66_v55, %v68_v56  ;;  %v999_v48 = vpack.c.bf16 %v219_v47, %v218_v46  ;;  %v299_v56 = vld [vmem:[%s1311_s1 + $0x50] sm:$0xff]  ;;  %vm376_vm4 = vcmask 121856   ;;  %vm841_vm5 = vcmask 31744  }
  0x9d   :  { %v88_v2 = vadd.s32 1, %v1163_v61  ;;  %v85_v3 = vmul.u32 %v78_v30, %v69_v1  ;;  %vm87_vm6 = vc.u32 %v1166_v63, %v1162_v60  ;;  %v86_v19 = vadd.s32 %v1162_v60, %v1166_v63  ;;  %v460_v63 = vld [vmem:[%s1311_s1 + $0x78] sm:$0xff]  ;;  %v461_v1 = vld [vmem:[%s1311_s1 + $0x80] sm:$0xff] }
  0x9e   :  { %1000 = vmatpush3.bf16.msra.mxu1 %v999_v48  ;;  %v1005_v60 = vpack.c.bf16 %v300_v57, %v299_v56  ;;  %v879_v48 = vld [vmem:[%s1311_s1 + $0x110] ss:$0 sm:$0xff] }
  0x9f   :  { %v89_v5 = vsel %vm87_vm6, %v88_v2, %v1163_v61  ;;  %1008 = vmatprep.subr.bf16.mxu1 %v1094_v4  ;;  %v1009_v2 = vpack.c.bf16 %v461_v1, %v460_v63  ;;  %v807_v1 = vpop.permute.xlu0 %806  ;;  %vm843_vm6 = vcmask 64512  }
  0xa0   :  { %v90_v7 = vadd.s32 %v89_v5, %v85_v3  ;;  %v462_v3 = vld [vmem:[%s1311_s1 + $0x88] sm:$0xff]  ;;  %v463_v5 = vld [vmem:[%s1311_s1 + $0x90] sm:$0xff] }
  0xa2   :  { %v91_v8 = vadd.s32 536870912, %v90_v7 }
  0xa4   :  { %v92_v9 = vshrl.u32 %v91_v8, 30  ;;  %v543_v8 = vld [vmem:[%s1311_s1 + $0xa0] sm:$0xff] }
  0xa6   :  { %v93_v10 = vshll.u32 %v92_v9, 30  ;;  %v116_v31 = vsub.s32 4, %v92_v9 }
  0xa8   :  { %v94_v11 = vsub.s32 %v90_v7, %v93_v10  ;;  %v117_v34 = vsel %vm32_vm8, %v116_v31, %v92_v9  ;;  %v1012_v7 = vpack.c.bf16 %v463_v5, %v462_v3  ;;  %v544_v9 = vld [vmem:[%s1311_s1 + $0xa8] sm:$0xff] }
  0xa9   :  { %v119_v36 = vsel %vm31_vm9, 0, %v117_v34  ;;  %v1015_v10 = vpack.c.bf16 %v544_v9, %v543_v8 }
  0xaa   :  { %v96_v12 = vsub.s32 0, %v94_v11  ;;  %v123_v37 = vadd.s32 3, %v119_v36  ;;  %v710_v36 = vld [vmem:[%s1311_s1 + $0xf8] sm:$0xff] }
  0xac   :  { %v862_v13 = vmin.u32 %v96_v12, %v94_v11  ;;  %v124_v38 = vand.u32 3, %v123_v37 }
  0xae   :  { %v98_v15 = vclz %v862_v13  ;;  %vm129_vm10 = vcmp.eq.s32.totalorder %v124_v38, 2  ;;  %vm126_vm11 = vcmp.eq.s32.totalorder %v124_v38, 0  ;;  %vm125_vm12 = vcmp.lt.s32.totalorder %v124_v38, 2 }
  0xb0   :  { %v863_v17 = vadd.s32 4294967294, %v98_v15  ;;  %v872_v15 = vld [vmem:[%s1311_s1 + $0x70] ss:$0 sm:$0xff] }
  0xb2   :  { %vm864_vm7 = vcmp.lt.s32.totalorder %v863_v17, 0 }
  0xb3   :  { %v101_v18 = vsel %vm864_vm7, 0, %v863_v17 }
  0xb4   :  { %v102_v20 = vsub.s32 32, %v101_v18  ;;  %v106_v21 = vsub.s32 4294967266, %v101_v18  ;;  %v103_v22 = vshll.u32 %v94_v11, %v101_v18 }
  0xb6   :  { %v104_v23 = vshrl.u32 %v86_v19, %v102_v20  ;;  %v107_v24 = vadd.s32 127, %v106_v21  ;;  %v545_v21 = vld [vmem:[%s1311_s1 + $0xb0] sm:$0xff] }
  0xb8   :  { %v105_v25 = vor.u32 %v104_v23, %v103_v22  ;;  %v108_v26 = vshll.u32 %v107_v24, 23  ;;  %v546_v22 = vld [vmem:[%s1311_s1 + $0xb8] sm:$0xff]  ;;  %v626_v24 = vld [vmem:[%s1311_s1 + $0xc8] sm:$0xff] }
  0xb9   :  { %v1018_v23 = vpack.c.bf16 %v546_v22, %v545_v21 }
  0xba   :  { %v109_v27 = vor.u32 4788187, %v108_v26  ;;  %v112_v29 = vcvt.s32.f32 %v105_v25  ;;  %v627_v25 = vld [vmem:[%s1311_s1 + $0xd0] sm:$0xff] }
  0xbb   :  { %v1021_v26 = vpack.c.bf16 %v627_v25, %v626_v24 }
  0xbc   :  { %v110_v28 = vand.u32 2147483647, %v109_v27  ;;  %v873_v27 = vld [vmem:[%s1311_s1 + $0x98] ss:$0 sm:$0xff] }
  0xbe   :  { %v113_v30 = vmul.f32 %v112_v29, %v110_v28 }
  0xc0   :  { %v114_v32 = vxor.u32 2147483648, %v113_v30 }
  0xc2   :  { %v115_v33 = vsel %vm32_vm8, %v114_v32, %v113_v30  ;;  %v628_v32 = vld [vmem:[%s1311_s1 + $0xd8] sm:$0xff] }
  0xc3   :  { %v118_v35 = vsel %vm31_vm9, %v1156_v14, %v115_v33  ;;  %v301_v14 = vld [vmem:[%s1311_s1 + $0x60] sm:$0xff] }
  0xc4   :  { %1053 = vcosq.f32 %v118_v35  ;;  %v1002_v50 = vpack.c.bf16 %v302_v49, %v301_v14  ;;  %v629_v33 = vld [vmem:[%s1311_s1 + $0xe0] sm:$0xff] }
  0xc5   :  { %1055 = vsinq.f32 %v118_v35  ;;  %v1024_v34 = vpack.c.bf16 %v629_v33, %v628_v32  ;;  %v709_v35 = vld [vmem:[%s1311_s1 + $0xf0] sm:$0xff] }
  0xc6   :  { %v1027_v37 = vpack.c.bf16 %v710_v36, %v709_v35 }
  0xce   :  { %v1054_v39 = vpop.eup %1053 }
  0xcf   :  { %v1056_v40 = vpop.eup %1055  ;;  %v130_v41 = vxor.u32 2147483648, %v1054_v39 }
  0xd0   :  { %v127_v42 = vxor.u32 2147483648, %v1056_v40 }
  0xd1   :  { %v131_v43 = vsel %vm129_vm10, %v130_v41, %v1056_v40 }
  0xd2   :  { %v128_v44 = vsel %vm126_vm11, %v1054_v39, %v127_v42  ;;  %v711_v42 = vld [vmem:[%s1311_s1 + $0x100] sm:$0xff] }
  0xd3   :  { %v132_v16 = vsel %vm125_vm12, %v128_v44, %v131_v43  ;;  %v712_v43 = vld [vmem:[%s1311_s1 + $0x108] sm:$0xff] }
  0xd4   :  { %v133_v45 = vsel %vm122_vm14, nan, %v132_v16  ;;  %v1030_v44 = vpack.c.bf16 %v712_v43, %v711_v42 }
  0xd5   :  { %921 = vmatmul.mubr.msk.f32.vlgmr.msra.gmra.mrb[0].mxu0 %vm141_vm13, %v133_v45 }
  0xd6   :  { %938 = vmatprep.mubr.msk.f32.mxu0 %vm1095_vm0, %v1096_v6  ;;  %1003 = vmatpush3.bf16.msra.mxu0 %v1002_v50 }
  0xd7   :  { %1004 = vmatprep.subr.bf16.mxu0 %v1094_v4 }
 0x1a8   :  { %v211_v52 = vpop.f32.mrb[0].mxu0 }
 0x1a9   :  { %v212_v53 = vadd.f32 %v865_v51, %v211_v52  ;;  %v922_v54 = vpop.f32.mrb[1].mxu0 }
 0x1ab   :  { %v215_v55 = vmax.f32 %v212_v53, 0.0 }
 0x1ad   :  { %932 = vmatmul.mubr.msk.f32.vlgmr.msra.gmra.mrb[0].mxu1 %vm225_vm15, %v215_v55 }
 0x1ae   :  { %956 = vmatprep.mubr.msk.f32.mxu1 %vm1095_vm0, %v1096_v6  ;;  %1010 = vmatpush3.bf16.msra.mxu1 %v1009_v2 }
 0x1af   :  { %1011 = vmatprep.subr.bf16.mxu1 %v1094_v4 }
 0x1b2   :  { %1013 = vmatpush3.bf16.msra.mxu1 %v1012_v7 }
 0x1b3   :  { %1020 = vmatprep.subr.bf16.mxu1 %v1094_v4 }
 0x280   :  { %v295_v59 = vpop.f32.mrb[0].mxu1 }
 0x281   :  { %v296_v61 = vadd.f32 %v867_v58, %v295_v59  ;;  %v933_v62 = vpop.f32.mrb[1].mxu1 }
 0x283   :  { %939 = vmatmul.mubr.msk.f32.vlgmr.msra.gmra.mrb[2].mxu0 %vm141_vm13, %v296_v61 }
 0x284   :  { %1007 = vmatpush3.bf16.msk.msra.mxu0 %vm1006_vm3, %v1005_v60  ;;  %945 = vmatprep.mubr.msk.f32.mxu0 %vm1095_vm0, %v1096_v6 }
 0x285   :  { %1014 = vmatprep.subr.bf16.mxu0 %v1094_v4 }
 0x287   :  { %946 = vmatmul.mubr.msk.f32.vlgmr.msra.gmra.mrb[4].mxu0 %vm376_vm4, %v1127_v0 }
 0x288   :  { %967 = vmatprep.mubr.msk.f32.mxu0 %vm1095_vm0, %v1096_v6  ;;  %1016 = vmatpush3.bf16.msra.mxu0 %v1015_v10 }
 0x289   :  { %1017 = vmatprep.subr.bf16.mxu0 %v1094_v4 }
 0x28c   :  { %1019 = vmatpush3.bf16.msra.mxu0 %v1018_v23 }
 0x28d   :  { %1026 = vmatprep.subr.bf16.mxu0 %v1094_v4 }
 0x356   :  { %v372_v11 = vpop.f32.mrb[2].mxu0 }
 0x357   :  { %v940_v12 = vpop.f32.mrb[3].mxu0 }
 0x35a   :  { %v449_v13 = vpop.f32.mrb[4].mxu0 }
 0x35b   :  { %v450_v17 = vadd.f32 %v449_v13, %v372_v11  ;;  %v947_v18 = vpop.f32.mrb[5].mxu0 }
 0x35d   :  { %v458_v19 = vadd.f32 %v872_v15, %v450_v17 }
 0x35f   :  { %v459_v20 = vmax.f32 %v458_v19, 0.0  ;;  %v815_v19 = vmul.f32 %v1127_v0, %v1127_v0 }
 0x361   :  { %957 = vmatmul.mubr.msk.f32.vlgmr.msra.gmra.mrb[2].mxu1 %vm225_vm15, %v459_v20  ;;  %v816_v20 = vmul.f32 -0.5, %v815_v19 }
 0x362   :  { %978 = vmatprep.mubr.msk.f32.mxu1 %vm1095_vm0, %v1096_v6  ;;  %1022 = vmatpush3.bf16.msra.mxu1 %v1021_v26 }
 0x363   :  { %1023 = vmatprep.subr.bf16.mxu1 %v1094_v4 }
 0x366   :  { %1025 = vmatpush3.bf16.msra.mxu1 %v1024_v34 }
 0x434   :  { %v538_v28 = vpop.f32.mrb[2].mxu1 }
 0x435   :  { %v539_v29 = vadd.f32 %v873_v27, %v538_v28  ;;  %v958_v30 = vpop.f32.mrb[3].mxu1 }
 0x437   :  { %v542_v31 = vmax.f32 %v539_v29, 0.0 }
 0x439   :  { %968 = vmatmul.mubr.msk.f32.vlgmr.msra.gmra.mrb[6].mxu0 %vm225_vm15, %v542_v31 }
 0x43a   :  { %989 = vmatprep.mubr.msk.f32.mxu0 %vm1095_vm0, %v1096_v6  ;;  %1028 = vmatpush3.bf16.msra.mxu0 %v1027_v37  ;;  %v875_v6 = vld [vmem:[%s1311_s1 + $0xc0] ss:$0 sm:$0xff] }
 0x43b   :  { %1029 = vmatprep.subr.bf16.mxu0 %v1094_v4  ;;  %v877_v4 = vld [vmem:[%s1311_s1 + $0xe8] ss:$0 sm:$0xff]  ;;  %s1105_s1 = smov 124  }
 0x43e   :  { %1031 = vmatpush3.bf16.msra.mxu0 %v1030_v44 }
 0x50c   :  { %v621_v38 = vpop.f32.mrb[6].mxu0 }
 0x50d   :  { %v622_v39 = vadd.f32 %v875_v6, %v621_v38  ;;  %v969_v40 = vpop.f32.mrb[7].mxu0 }
 0x50f   :  { %v625_v41 = vmax.f32 %v622_v39, 0.0 }
 0x511   :  { %979 = vmatmul.mubr.msk.f32.vlgmr.msra.gmra.mrb[4].mxu1 %vm225_vm15, %v625_v41 }
 0x5e4   :  { %v704_v16 = vpop.f32.mrb[4].mxu1 }
 0x5e5   :  { %v705_v45 = vadd.f32 %v877_v4, %v704_v16  ;;  %v980_v46 = vpop.f32.mrb[5].mxu1 }
 0x5e7   :  { %v708_v47 = vmax.f32 %v705_v45, 0.0 }
 0x5e9   :  { %990 = vmatmul.mubr.msk.f32.vlgmr.msra.gmra.mrb[8].mxu0 %vm225_vm15, %v708_v47 }
 0x6bc   :  { %v787_v14 = vpop.f32.mrb[8].mxu0 }
 0x6bd   :  { %v788_v49 = vadd.f32 %v879_v48, %v787_v14  ;;  %v991_v50 = vpop.f32.mrb[9].mxu0 }
 0x6bf   :  { %v792_v51 = vand.u32 2147483647, %v788_v49  ;;  %v791_v62 = vmax.f32 %v788_v49, 0.0 }
 0x6c1   :  { %v793_v52 = vsub.f32 0.0, %v792_v51 }
 0x6c3   :  { %v794_v53 = vmul.f32 1.442695, %v793_v52 }
 0x6c5   :  { %1057 = vpow2.f32 %v794_v53 }
 0x6cf   :  { %v1058_v54 = vpop.eup %1057 }
 0x6d0   :  { %v796_v55 = vadd.f32 1.0, %v1058_v54  ;;  %v799_v56 = vmul.f32 -0.5, %v1058_v54  ;;  %v802_v58 = vand.u32 2147483647, %v1058_v54 }
 0x6d2   :  { %1059 = vlog2.f32 %v796_v55  ;;  %v800_v57 = vadd.f32 1.0, %v799_v56  ;;  %vm803_vm0 = vcmp.lt.f32.partialorder %v802_v58, 0.0004427343 }
 0x6d4   :  { %v801_v61 = vmul.f32 %v1058_v54, %v800_v57 }
 0x6dc   :  { %v1060_v59 = vpop.eup %1059 }
 0x6dd   :  { %v798_v60 = vmul.f32 0.6931472, %v1060_v59 }
 0x6df   :  { %v804_v63 = vsel %vm803_vm0, %v801_v61, %v798_v60 }
 0x6e0   :  { %v805_v2 = vadd.f32 %v804_v63, %v791_v62 }
 0x6e2   :  { %1061 = vlog2.f32 %v805_v2  ;;  %v809_v3 = vmul.f32 %v807_v1, %v805_v2 }
 0x6e4   :  { %811 = vrot.lane.b32.xlu1 %v809_v3, %s1105_s1 }
 0x6ec   :  { %v1062_v5 = vpop.eup %1061 }
 0x6ed   :  { %v818_v7 = vmul.f32 0.6931472, %v1062_v5 }
 0x6ef   :  { %820 = vrot.lane.b32.xlu1 %v818_v7, %s1106_s23 }
 0x756   :  { %v812_v8 = vpop.permute.xlu1 %811 }
 0x757   :  { %v814_v9 = vadd.f32 %v812_v8, %v788_v49 }
 0x759   :  { %1063 = vtanh.f32 %v814_v9 }
 0x761   :  { %v821_v21 = vpop.permute.xlu1 %820 }
 0x762   :  { %v823_v22 = vsub.f32 %v816_v20, %v821_v21 }
 0x763   :  { %v1064_v10 = vpop.eup %1063 }
 0x764   :  { %1065 = vtanh.f32 %v1064_v10  ;;  %v881_v23 = vadd.f32 -0.9189385, %v823_v22 }
 0x76e   :  { %v1066_v11 = vpop.eup %1065 }
 0x76f   :  { %v827_v12 = vmul.f32 %v1066_v11, %v1066_v11 }
 0x771   :  { %v828_v13 = vsub.f32 1.0, %v827_v12 }
 0x773   :  { %v829_v15 = vadd.f32 1e-07, %v828_v13 }
 0x775   :  { %1067 = vlog2.f32 %v829_v15 }
 0x77f   :  { %v1068_v17 = vpop.eup %1067 }
 0x780   :  { %v831_v18 = vmul.f32 0.6931472, %v1068_v17 }
 0x782   :  { %833 = vrot.lane.b32.xlu0 %v831_v18, %s1107_s24 }
 0x7f4   :  { %v834_v24 = vpop.permute.xlu0 %833 }
 0x7f5   :  { %v836_v25 = vsub.f32 %v881_v23, %v834_v24 }
 0x7f7   :  { %838 = vrot.lane.b32.xlu1 %v836_v25, %s1104_s18 }
 0x869   :  { %v839_v26 = vpop.permute.xlu1 %838 }
 0x86a   :  { %v842_v27 = vsel %vm841_vm5, %v1064_v10, %v839_v26 }
 0x86b   :  { %844 = vst.msk [vmem:[#allocation2] sm:$0xff] %vm843_vm6, %v842_v27 }
 0x86c   :  { %1080 = shalt.err (!%p1077_p4)
}
 0x86d   :  { %s1081_s30 = scalar_lea.hbm %s1312_s2, 128 }
 0x86e   :  { %p1082_p5 = scmp.ne.s32.totalorder %s1312_s2, %s1081_s30  ;;  %p1085_p6 = scmp.lt.u32.totalorder %s1081_s30, %s1312_s2 }
 0x870   :  { %p1087_p7 = pnand %p1085_p6, %p1082_p5 }
 0x872   :  { %1090 = shalt.err (!%p1087_p7)
}
 0x873   :  { %854 = dma.vmem_to_hbm [thread:$0]  %s852_s26, 128, %s1312_s2, [#allocation3]  }
 0x874   :  { %1091 = dma.done.wait [#allocation3], 128  }
 0x875   :  { %1092 = vsyncadd [#allocation3], 4294967168 }
 0x876   :  { %858 = vsyncpa [#allocation3], 1 }

</bundles_post_ra>
